<compile_context>
chip_gen: v7x
topology: tpu7x:2x2x1
jax: 0.10.0
libtpu: 0.0.40
codegen_flags: <defaults>
</compile_context>

<pallas_src>
import jax
import jax.numpy as jnp
from jax import lax
from jax.experimental import pallas as pl
from jax.experimental.pallas import tpu as pltpu

Cin = 16
Cout = 4
KH, KW = 3, 3
K = KH * KW * Cin            # 144


def _make_kernel(N, H, W):
    HW = H * W

    def kernel(x_ref, w_ref, b_ref, o_ref, patch_ref):
        # x_ref:     (N, Cin, H*W)     batch, spatial flattened on lanes
        # w_ref:     (Cout, K)         flattened (co, kh, kw, ci) weights
        # b_ref:     (Cout, 1)         bias column
        # o_ref:     (2, N, Cout, H*W) both cat() copies of every sample
        # patch_ref: (K, N*H*W)        VMEM im2col scratch
        x = x_ref[...].reshape(N * Cin, HW)          # sublane-concat, free

        # Build the im2col patch with lane rolls (XLU): for tap t=(kh,kw),
        #   patch[t*Cin + ci, n*HW + p] = x[n, ci, p + kh*W + kw]
        # which is exactly the conv tap for every valid output p = oh*W + ow
        # (never wraps for valid p since p + s <= HW - 1).
        for kh in range(KH):
            for kw in range(KW):
                t = kh * KW + kw
                s = kh * W + kw
                shifted = x if s == 0 else pltpu.roll(x, HW - s, axis=1)
                for n in range(N):
                    patch_ref[t * Cin:(t + 1) * Cin, n * HW:(n + 1) * HW] = (
                        shifted[n * Cin:(n + 1) * Cin, :])

        # Single fused MXU matmul: (Cout, K) @ (K, N*HW) -> (Cout, N*HW).
        acc = jnp.dot(w_ref[...], patch_ref[...],
                      preferred_element_type=jnp.float32)
        acc = acc + b_ref[...]                                   # bias add

        # Numerically-stable log_softmax over the channel axis (axis 0).
        m = jnp.max(acc, axis=0, keepdims=True)
        lse = m + jnp.log(jnp.sum(jnp.exp(acc - m), axis=0, keepdims=True))
        res = (acc - lse).astype(o_ref.dtype)                    # (Cout, N*HW)

        # x0 == x1 (same conv, same input): both cat() halves get the block.
        for n in range(N):
            blk = res[:, n * HW:(n + 1) * HW]                    # (Cout, HW)
            o_ref[0, n] = blk
            o_ref[1, n] = blk

    return kernel


def conv_logsoftmax_batched(x_flat, w_flat, b_col, H, W):
    """x_flat: (N, Cin, H*W) f32; w_flat: (Cout, K) f32; b_col: (Cout, 1) f32.
    Returns (2, N, Cout, H*W): conv+bias+channel-log_softmax at every position
    of the full (H, W) grid (positions past the valid window hold garbage and
    are sliced off by the caller), duplicated along the leading cat() axis.
    """
    N = x_flat.shape[0]
    HW = H * W
    kernel = _make_kernel(N, H, W)
    return pl.pallas_call(
        kernel,
        out_shape=jax.ShapeDtypeStruct((2, N, Cout, HW), jnp.float32),
        grid=(1,),
        in_specs=[
            pl.BlockSpec((N, Cin, HW), lambda i: (0, 0, 0)),
            pl.BlockSpec((Cout, K), lambda i: (0, 0)),
            pl.BlockSpec((Cout, 1), lambda i: (0, 0)),
        ],
        out_specs=pl.BlockSpec((2, N, Cout, HW), lambda i: (0, 0, 0, 0)),
        scratch_shapes=[pltpu.VMEM((K, N * HW), jnp.float32)],
        compiler_params=pltpu.CompilerParams(
            dimension_semantics=("arbitrary",),
        ),
    )(x_flat, w_flat, b_col)


def pack_params(w_oihw, b):
    """One-time parameter packing (kept OUT of the per-forward path).
    OIHW -> (Cout, KH, KW, Cin) -> (Cout, 144); bias -> (Cout, 1)."""
    w_flat = jnp.transpose(w_oihw, (0, 2, 3, 1)).reshape(Cout, K)
    b_col = b.reshape(Cout, 1)
    return w_flat, b_col


def net_forward(x_nchw, w_flat, b_col):
    """Matches PyTorch Net.forward: (N, Cin, H, W) -> (2N, Cout, H-2, W-2)."""
    N, _, H, W = x_nchw.shape
    Hout, Wout = H - KH + 1, W - KW + 1
    x_flat = x_nchw.reshape(N, Cin, H * W)                   # free reshape
    y = conv_logsoftmax_batched(x_flat, w_flat, b_col, H, W)  # (2,N,Cout,H*W)
    # (2, N, ...) -> (2N, ...) matches torch.cat([x0, x1], 0) since x0 == x1;
    # then drop the invalid right/bottom columns of the full-width result
    # (kept in the wrapper to preserve the lane-dense in-kernel stores).
    return y.reshape(2 * N, Cout, H, W)[:, :, :Hout, :Wout]


if __name__ == "__main__":
    key = jax.random.PRNGKey(0)
    k_x, k_w, k_b = jax.random.split(key, 3)

    N, H, W = 2, 16, 16
    x = jax.random.normal(k_x, (N, Cin, H, W), dtype=jnp.float32)

    # Deterministic parameter init (same scale as PyTorch Conv2d default).
    fan_in = Cin * KH * KW
    bound = 1.0 / (fan_in ** 0.5)
    w = jax.random.uniform(k_w, (Cout, Cin, KH, KW), jnp.float32, -bound, bound)
    b = jax.random.uniform(k_b, (Cout,), jnp.float32, -bound, bound)

    # Pack parameters once, outside the jitted forward.
    w_flat, b_col = pack_params(w, b)

    fwd = jax.jit(net_forward)
    out = jax.block_until_ready(fwd(x, w_flat, b_col))

    # Shape + log_softmax sanity.
    assert out.shape == (2 * N, Cout, H - 2, W - 2), out.shape
    probs_sum = jnp.sum(jnp.exp(out), axis=1)
    assert bool(jnp.allclose(probs_sum, 1.0, atol=1e-4)), "log_softmax check failed"

    # Numerical check against a pure-JAX reference (full f32 precision conv).
    conv = lax.conv_general_dilated(
        x, w, window_strides=(1, 1), padding="VALID",
        dimension_numbers=("NCHW", "OIHW", "NCHW"),
        precision=lax.Precision.HIGHEST,
    ) + b.reshape(1, Cout, 1, 1)
    ref = jax.nn.log_softmax(jnp.concatenate([conv, conv], axis=0), axis=1)
    assert bool(jnp.allclose(out, ref, atol=1e-3, rtol=1e-3)), "mismatch vs reference"

    print("KERNEL_OK")
</pallas_src>

<mosaic_0001>
module attributes {stable_mosaic.version = 11 : i64} {
  func.func @kernel(%arg0: i32, %arg1: memref<2x16x256xf32, #tpu.memory_space<vmem>>, %arg2: memref<4x144xf32, #tpu.memory_space<vmem>>, %arg3: memref<4x1xf32, #tpu.memory_space<vmem>>, %arg4: memref<2x2x4x256xf32, #tpu.memory_space<vmem>>, %arg5: memref<144x512xf32, #tpu.memory_space<vmem>>) attributes {dimension_semantics = [#tpu.dimension_semantics<arbitrary>], iteration_bounds = array<i64: 1>, scalar_prefetch = 0 : i64, scratch_operands = 1 : i64, tpu.core_type = #tpu.core_type<tc>, window_params = [{pipeline_mode = #tpu.pipeline_mode<synchronous>, transform_indices = @transform_0, window_bounds = array<i64: 2, 16, 256>}, {pipeline_mode = #tpu.pipeline_mode<synchronous>, transform_indices = @transform_1, window_bounds = array<i64: 4, 144>}, {pipeline_mode = #tpu.pipeline_mode<synchronous>, transform_indices = @transform_2, window_bounds = array<i64: 4, 1>}, {pipeline_mode = #tpu.pipeline_mode<synchronous>, transform_indices = @transform_3, window_bounds = array<i64: 2, 2, 4, 256>}]} {
    %c0 = arith.constant 0 : index
    %c0_0 = arith.constant 0 : index
    %c0_1 = arith.constant 0 : index
    %0 = vector.load %arg1[%c0, %c0_0, %c0_1] : memref<2x16x256xf32, #tpu.memory_space<vmem>>, vector<2x16x256xf32>
    %1 = vector.shape_cast %0 : vector<2x16x256xf32> to vector<32x256xf32>
    %2 = vector.extract_strided_slice %1 {offsets = [0, 0], sizes = [16, 256], strides = [1, 1]} : vector<32x256xf32> to vector<16x256xf32>
    %c0_2 = arith.constant 0 : index
    %c0_3 = arith.constant 0 : index
    %3 = vector.load %arg5[%c0_2, %c0_3] : memref<144x512xf32, #tpu.memory_space<vmem>>, vector<16x256xf32>
    tpu.vector_store %arg5[%c0_2, %c0_3], %2 {strides = array<i32>} : memref<144x512xf32, #tpu.memory_space<vmem>>, vector<16x256xf32>,
    %4 = vector.extract_strided_slice %1 {offsets = [16, 0], sizes = [16, 256], strides = [1, 1]} : vector<32x256xf32> to vector<16x256xf32>
    %c0_4 = arith.constant 0 : index
    %c256 = arith.constant 256 : index
    %5 = vector.load %arg5[%c0_4, %c256] : memref<144x512xf32, #tpu.memory_space<vmem>>, vector<16x256xf32>
    tpu.vector_store %arg5[%c0_4, %c256], %4 {strides = array<i32>} : memref<144x512xf32, #tpu.memory_space<vmem>>, vector<16x256xf32>,
    %c255_i32 = arith.constant 255 : i32
    %6 = tpu.dynamic_rotate %1 by %c255_i32 dim 1 : vector<32x256xf32>, i32 -> vector<32x256xf32>
    %7 = vector.extract_strided_slice %6 {offsets = [0, 0], sizes = [16, 256], strides = [1, 1]} : vector<32x256xf32> to vector<16x256xf32>
    %c16 = arith.constant 16 : index
    %c0_5 = arith.constant 0 : index
    %8 = vector.load %arg5[%c16, %c0_5] : memref<144x512xf32, #tpu.memory_space<vmem>>, vector<16x256xf32>
    tpu.vector_store %arg5[%c16, %c0_5], %7 {strides = array<i32>} : memref<144x512xf32, #tpu.memory_space<vmem>>, vector<16x256xf32>,
    %9 = vector.extract_strided_slice %6 {offsets = [16, 0], sizes = [16, 256], strides = [1, 1]} : vector<32x256xf32> to vector<16x256xf32>
    %c16_6 = arith.constant 16 : index
    %c256_7 = arith.constant 256 : index
    %10 = vector.load %arg5[%c16_6, %c256_7] : memref<144x512xf32, #tpu.memory_space<vmem>>, vector<16x256xf32>
    tpu.vector_store %arg5[%c16_6, %c256_7], %9 {strides = array<i32>} : memref<144x512xf32, #tpu.memory_space<vmem>>, vector<16x256xf32>,
    %c254_i32 = arith.constant 254 : i32
    %11 = tpu.dynamic_rotate %1 by %c254_i32 dim 1 : vector<32x256xf32>, i32 -> vector<32x256xf32>
    %12 = vector.extract_strided_slice %11 {offsets = [0, 0], sizes = [16, 256], strides = [1, 1]} : vector<32x256xf32> to vector<16x256xf32>
    %c32 = arith.constant 32 : index
    %c0_8 = arith.constant 0 : index
    %13 = vector.load %arg5[%c32, %c0_8] : memref<144x512xf32, #tpu.memory_space<vmem>>, vector<16x256xf32>
    tpu.vector_store %arg5[%c32, %c0_8], %12 {strides = array<i32>} : memref<144x512xf32, #tpu.memory_space<vmem>>, vector<16x256xf32>,
    %14 = vector.extract_strided_slice %11 {offsets = [16, 0], sizes = [16, 256], strides = [1, 1]} : vector<32x256xf32> to vector<16x256xf32>
    %c32_9 = arith.constant 32 : index
    %c256_10 = arith.constant 256 : index
    %15 = vector.load %arg5[%c32_9, %c256_10] : memref<144x512xf32, #tpu.memory_space<vmem>>, vector<16x256xf32>
    tpu.vector_store %arg5[%c32_9, %c256_10], %14 {strides = array<i32>} : memref<144x512xf32, #tpu.memory_space<vmem>>, vector<16x256xf32>,
    %c240_i32 = arith.constant 240 : i32
    %16 = tpu.dynamic_rotate %1 by %c240_i32 dim 1 : vector<32x256xf32>, i32 -> vector<32x256xf32>
    %17 = vector.extract_strided_slice %16 {offsets = [0, 0], sizes = [16, 256], strides = [1, 1]} : vector<32x256xf32> to vector<16x256xf32>
    %c48 = arith.constant 48 : index
    %c0_11 = arith.constant 0 : index
    %18 = vector.load %arg5[%c48, %c0_11] : memref<144x512xf32, #tpu.memory_space<vmem>>, vector<16x256xf32>
    tpu.vector_store %arg5[%c48, %c0_11], %17 {strides = array<i32>} : memref<144x512xf32, #tpu.memory_space<vmem>>, vector<16x256xf32>,
    %19 = vector.extract_strided_slice %16 {offsets = [16, 0], sizes = [16, 256], strides = [1, 1]} : vector<32x256xf32> to vector<16x256xf32>
    %c48_12 = arith.constant 48 : index
    %c256_13 = arith.constant 256 : index
    %20 = vector.load %arg5[%c48_12, %c256_13] : memref<144x512xf32, #tpu.memory_space<vmem>>, vector<16x256xf32>
    tpu.vector_store %arg5[%c48_12, %c256_13], %19 {strides = array<i32>} : memref<144x512xf32, #tpu.memory_space<vmem>>, vector<16x256xf32>,
    %c239_i32 = arith.constant 239 : i32
    %21 = tpu.dynamic_rotate %1 by %c239_i32 dim 1 : vector<32x256xf32>, i32 -> vector<32x256xf32>
    %22 = vector.extract_strided_slice %21 {offsets = [0, 0], sizes = [16, 256], strides = [1, 1]} : vector<32x256xf32> to vector<16x256xf32>
    %c64 = arith.constant 64 : index
    %c0_14 = arith.constant 0 : index
    %23 = vector.load %arg5[%c64, %c0_14] : memref<144x512xf32, #tpu.memory_space<vmem>>, vector<16x256xf32>
    tpu.vector_store %arg5[%c64, %c0_14], %22 {strides = array<i32>} : memref<144x512xf32, #tpu.memory_space<vmem>>, vector<16x256xf32>,
    %24 = vector.extract_strided_slice %21 {offsets = [16, 0], sizes = [16, 256], strides = [1, 1]} : vector<32x256xf32> to vector<16x256xf32>
    %c64_15 = arith.constant 64 : index
    %c256_16 = arith.constant 256 : index
    %25 = vector.load %arg5[%c64_15, %c256_16] : memref<144x512xf32, #tpu.memory_space<vmem>>, vector<16x256xf32>
    tpu.vector_store %arg5[%c64_15, %c256_16], %24 {strides = array<i32>} : memref<144x512xf32, #tpu.memory_space<vmem>>, vector<16x256xf32>,
    %c238_i32 = arith.constant 238 : i32
    %26 = tpu.dynamic_rotate %1 by %c238_i32 dim 1 : vector<32x256xf32>, i32 -> vector<32x256xf32>
    %27 = vector.extract_strided_slice %26 {offsets = [0, 0], sizes = [16, 256], strides = [1, 1]} : vector<32x256xf32> to vector<16x256xf32>
    %c80 = arith.constant 80 : index
    %c0_17 = arith.constant 0 : index
    %28 = vector.load %arg5[%c80, %c0_17] : memref<144x512xf32, #tpu.memory_space<vmem>>, vector<16x256xf32>
    tpu.vector_store %arg5[%c80, %c0_17], %27 {strides = array<i32>} : memref<144x512xf32, #tpu.memory_space<vmem>>, vector<16x256xf32>,
    %29 = vector.extract_strided_slice %26 {offsets = [16, 0], sizes = [16, 256], strides = [1, 1]} : vector<32x256xf32> to vector<16x256xf32>
    %c80_18 = arith.constant 80 : index
    %c256_19 = arith.constant 256 : index
    %30 = vector.load %arg5[%c80_18, %c256_19] : memref<144x512xf32, #tpu.memory_space<vmem>>, vector<16x256xf32>
    tpu.vector_store %arg5[%c80_18, %c256_19], %29 {strides = array<i32>} : memref<144x512xf32, #tpu.memory_space<vmem>>, vector<16x256xf32>,
    %c224_i32 = arith.constant 224 : i32
    %31 = tpu.dynamic_rotate %1 by %c224_i32 dim 1 : vector<32x256xf32>, i32 -> vector<32x256xf32>
    %32 = vector.extract_strided_slice %31 {offsets = [0, 0], sizes = [16, 256], strides = [1, 1]} : vector<32x256xf32> to vector<16x256xf32>
    %c96 = arith.constant 96 : index
    %c0_20 = arith.constant 0 : index
    %33 = vector.load %arg5[%c96, %c0_20] : memref<144x512xf32, #tpu.memory_space<vmem>>, vector<16x256xf32>
    tpu.vector_store %arg5[%c96, %c0_20], %32 {strides = array<i32>} : memref<144x512xf32, #tpu.memory_space<vmem>>, vector<16x256xf32>,
    %34 = vector.extract_strided_slice %31 {offsets = [16, 0], sizes = [16, 256], strides = [1, 1]} : vector<32x256xf32> to vector<16x256xf32>
    %c96_21 = arith.constant 96 : index
    %c256_22 = arith.constant 256 : index
    %35 = vector.load %arg5[%c96_21, %c256_22] : memref<144x512xf32, #tpu.memory_space<vmem>>, vector<16x256xf32>
    tpu.vector_store %arg5[%c96_21, %c256_22], %34 {strides = array<i32>} : memref<144x512xf32, #tpu.memory_space<vmem>>, vector<16x256xf32>,
    %c223_i32 = arith.constant 223 : i32
    %36 = tpu.dynamic_rotate %1 by %c223_i32 dim 1 : vector<32x256xf32>, i32 -> vector<32x256xf32>
    %37 = vector.extract_strided_slice %36 {offsets = [0, 0], sizes = [16, 256], strides = [1, 1]} : vector<32x256xf32> to vector<16x256xf32>
    %c112 = arith.constant 112 : index
    %c0_23 = arith.constant 0 : index
    %38 = vector.load %arg5[%c112, %c0_23] : memref<144x512xf32, #tpu.memory_space<vmem>>, vector<16x256xf32>
    tpu.vector_store %arg5[%c112, %c0_23], %37 {strides = array<i32>} : memref<144x512xf32, #tpu.memory_space<vmem>>, vector<16x256xf32>,
    %39 = vector.extract_strided_slice %36 {offsets = [16, 0], sizes = [16, 256], strides = [1, 1]} : vector<32x256xf32> to vector<16x256xf32>
    %c112_24 = arith.constant 112 : index
    %c256_25 = arith.constant 256 : index
    %40 = vector.load %arg5[%c112_24, %c256_25] : memref<144x512xf32, #tpu.memory_space<vmem>>, vector<16x256xf32>
    tpu.vector_store %arg5[%c112_24, %c256_25], %39 {strides = array<i32>} : memref<144x512xf32, #tpu.memory_space<vmem>>, vector<16x256xf32>,
    %c222_i32 = arith.constant 222 : i32
    %41 = tpu.dynamic_rotate %1 by %c222_i32 dim 1 : vector<32x256xf32>, i32 -> vector<32x256xf32>
    %42 = vector.extract_strided_slice %41 {offsets = [0, 0], sizes = [16, 256], strides = [1, 1]} : vector<32x256xf32> to vector<16x256xf32>
    %c128 = arith.constant 128 : index
    %c0_26 = arith.constant 0 : index
    %43 = vector.load %arg5[%c128, %c0_26] : memref<144x512xf32, #tpu.memory_space<vmem>>, vector<16x256xf32>
    tpu.vector_store %arg5[%c128, %c0_26], %42 {strides = array<i32>} : memref<144x512xf32, #tpu.memory_space<vmem>>, vector<16x256xf32>,
    %44 = vector.extract_strided_slice %41 {offsets = [16, 0], sizes = [16, 256], strides = [1, 1]} : vector<32x256xf32> to vector<16x256xf32>
    %c128_27 = arith.constant 128 : index
    %c256_28 = arith.constant 256 : index
    %45 = vector.load %arg5[%c128_27, %c256_28] : memref<144x512xf32, #tpu.memory_space<vmem>>, vector<16x256xf32>
    tpu.vector_store %arg5[%c128_27, %c256_28], %44 {strides = array<i32>} : memref<144x512xf32, #tpu.memory_space<vmem>>, vector<16x256xf32>,
    %c0_29 = arith.constant 0 : index
    %c0_30 = arith.constant 0 : index
    %46 = vector.load %arg2[%c0_29, %c0_30] : memref<4x144xf32, #tpu.memory_space<vmem>>, vector<4x144xf32>
    %c0_31 = arith.constant 0 : index
    %c0_32 = arith.constant 0 : index
    %47 = vector.load %arg5[%c0_31, %c0_32] : memref<144x512xf32, #tpu.memory_space<vmem>>, vector<144x512xf32>
    %cst = arith.constant dense<0.000000e+00> : vector<4x512xf32>
    %48 = tpu.matmul %46, %47, %cst {dimension_numbers = #tpu.dot_dimension_numbers<[1], [0], [0], [1], [0, 0, 1, 1], [], []>} : vector<4x144xf32>, vector<144x512xf32>, vector<4x512xf32> -> vector<4x512xf32>
    %c0_33 = arith.constant 0 : index
    %c0_34 = arith.constant 0 : index
    %49 = vector.load %arg3[%c0_33, %c0_34] : memref<4x1xf32, #tpu.memory_space<vmem>>, vector<4x1xf32>
    %50 = vector.broadcast %49 : vector<4x1xf32> to vector<4x512xf32>
    %51 = arith.addf %48, %50 : vector<4x512xf32>
    %cst_35 = arith.constant dense<0xFF800000> : vector<512xf32>
    %52 = vector.multi_reduction <maximumf>, %51, %cst_35 [0] : vector<4x512xf32> to vector<512xf32>
    %53 = vector.shape_cast %52 : vector<512xf32> to vector<1x512xf32>
    %54 = vector.broadcast %53 : vector<1x512xf32> to vector<4x512xf32>
    %55 = arith.subf %51, %54 : vector<4x512xf32>
    %56 = math.exp %55 : vector<4x512xf32>
    %cst_36 = arith.constant dense<0.000000e+00> : vector<512xf32>
    %57 = vector.multi_reduction <add>, %56, %cst_36 [0] : vector<4x512xf32> to vector<512xf32>
    %58 = vector.shape_cast %57 : vector<512xf32> to vector<1x512xf32>
    %59 = math.log %58 : vector<1x512xf32>
    %60 = arith.addf %53, %59 : vector<1x512xf32>
    %61 = vector.broadcast %60 : vector<1x512xf32> to vector<4x512xf32>
    %62 = arith.subf %51, %61 : vector<4x512xf32>
    %63 = vector.extract_strided_slice %62 {offsets = [0, 0], sizes = [4, 256], strides = [1, 1]} : vector<4x512xf32> to vector<4x256xf32>
    %c0_37 = arith.constant 0 : index
    %c0_38 = arith.constant 0 : index
    %c0_39 = arith.constant 0 : index
    %c0_40 = arith.constant 0 : index
    %64 = vector.load %arg4[%c0_37, %c0_38, %c0_39, %c0_40] : memref<2x2x4x256xf32, #tpu.memory_space<vmem>>, vector<1x1x4x256xf32>
    %65 = vector.shape_cast %64 : vector<1x1x4x256xf32> to vector<4x256xf32>
    %66 = vector.shape_cast %63 : vector<4x256xf32> to vector<1x1x4x256xf32>
    tpu.vector_store %arg4[%c0_37, %c0_38, %c0_39, %c0_40], %66 {strides = array<i32>} : memref<2x2x4x256xf32, #tpu.memory_space<vmem>>, vector<1x1x4x256xf32>,
    %c1 = arith.constant 1 : index
    %c0_41 = arith.constant 0 : index
    %c0_42 = arith.constant 0 : index
    %c0_43 = arith.constant 0 : index
    %67 = vector.load %arg4[%c1, %c0_41, %c0_42, %c0_43] : memref<2x2x4x256xf32, #tpu.memory_space<vmem>>, vector<1x1x4x256xf32>
    %68 = vector.shape_cast %67 : vector<1x1x4x256xf32> to vector<4x256xf32>
    %69 = vector.shape_cast %63 : vector<4x256xf32> to vector<1x1x4x256xf32>
    tpu.vector_store %arg4[%c1, %c0_41, %c0_42, %c0_43], %69 {strides = array<i32>} : memref<2x2x4x256xf32, #tpu.memory_space<vmem>>, vector<1x1x4x256xf32>,
    %70 = vector.extract_strided_slice %62 {offsets = [0, 256], sizes = [4, 256], strides = [1, 1]} : vector<4x512xf32> to vector<4x256xf32>
    %c0_44 = arith.constant 0 : index
    %c1_45 = arith.constant 1 : index
    %c0_46 = arith.constant 0 : index
    %c0_47 = arith.constant 0 : index
    %71 = vector.load %arg4[%c0_44, %c1_45, %c0_46, %c0_47] : memref<2x2x4x256xf32, #tpu.memory_space<vmem>>, vector<1x1x4x256xf32>
    %72 = vector.shape_cast %71 : vector<1x1x4x256xf32> to vector<4x256xf32>
    %73 = vector.shape_cast %70 : vector<4x256xf32> to vector<1x1x4x256xf32>
    tpu.vector_store %arg4[%c0_44, %c1_45, %c0_46, %c0_47], %73 {strides = array<i32>} : memref<2x2x4x256xf32, #tpu.memory_space<vmem>>, vector<1x1x4x256xf32>,
    %c1_48 = arith.constant 1 : index
    %c1_49 = arith.constant 1 : index
    %c0_50 = arith.constant 0 : index
    %c0_51 = arith.constant 0 : index
    %74 = vector.load %arg4[%c1_48, %c1_49, %c0_50, %c0_51] : memref<2x2x4x256xf32, #tpu.memory_space<vmem>>, vector<1x1x4x256xf32>
    %75 = vector.shape_cast %74 : vector<1x1x4x256xf32> to vector<4x256xf32>
    %76 = vector.shape_cast %70 : vector<4x256xf32> to vector<1x1x4x256xf32>
    tpu.vector_store %arg4[%c1_48, %c1_49, %c0_50, %c0_51], %76 {strides = array<i32>} : memref<2x2x4x256xf32, #tpu.memory_space<vmem>>, vector<1x1x4x256xf32>,
    return
  }
  func.func @transform_0(%arg0: i32) -> (i32, i32, i32) {
    %c0_i32 = arith.constant 0 : i32
    %c0_i32_0 = arith.constant 0 : i32
    %c0_i32_1 = arith.constant 0 : i32
    %c0_i32_2 = arith.constant 0 : i32
    return %c0_i32, %c0_i32_0, %c0_i32_1 : i32, i32, i32
  }
  func.func @transform_1(%arg0: i32) -> (i32, i32) {
    %c0_i32 = arith.constant 0 : i32
    %c0_i32_0 = arith.constant 0 : i32
    %c0_i32_1 = arith.constant 0 : i32
    return %c0_i32, %c0_i32_0 : i32, i32
  }
  func.func @transform_2(%arg0: i32) -> (i32, i32) {
    %c0_i32 = arith.constant 0 : i32
    %c0_i32_0 = arith.constant 0 : i32
    %c0_i32_1 = arith.constant 0 : i32
    return %c0_i32, %c0_i32_0 : i32, i32
  }
  func.func @transform_3(%arg0: i32) -> (i32, i32, i32, i32) {
    %c0_i32 = arith.constant 0 : i32
    %c0_i32_0 = arith.constant 0 : i32
    %c0_i32_1 = arith.constant 0 : i32
    %c0_i32_2 = arith.constant 0 : i32
    %c0_i32_3 = arith.constant 0 : i32
    return %c0_i32, %c0_i32_0, %c0_i32_1, %c0_i32_2 : i32, i32, i32, i32
  }
}

</mosaic_0001>

<bundles_post_ra>
// kernel: net_forward.1
= control target key start
LH: loop header
LB: loop body
LE: loop exit
PB: predicated region body
PF: predicated region fallthrough
CT: control target
= control target key end

     0   :  { %s890_s28 = smov 127   ;;  %s891_s29 = smov 126   ;;  %vm377_vm0 = vcmask 130048   ;;  %v898_v18 = vmov 0   ;;  %v46_v20 = vlaneseq  ;;  %vm522_vm9 = vcmask 1043456   ;;  %s1147_s0 = inlined_call_operand.vmem [shape: f32[2,16,256], index: 0, kind: input, shape index: {}]   ;;  %s1148_s1 = inlined_call_operand.vmem [shape: f32[4,144], index: 1, kind: input, shape index: {}]   ;;  %s1149_s2 = inlined_call_operand.vmem [shape: f32[4,1], index: 2, kind: input, shape index: {}]   ;;  %s1150_s3 = inlined_call_operand.vmem [shape: f32[2,2,4,256], index: 3, kind: output, shape index: {}]  }
   0x1   :  { %v15_v0 = vld [vmem:[%s1147_s0 + $0x8] sm:$0xff]  ;;  %v17_v1 = vld [vmem:[%s1147_s0 + $0x18] sm:$0xff]  ;;  %v14_v2 = vld [vmem:[%s1147_s0] sm:$0xff]  ;;  %s893_s30 = smov 111   ;;  %s894_s4 = smov 110   ;;  %872 = vset.pattern.permute.xlu0 %v898_v18 }
   0x2   :  { %v928_v3 = vpack.i.bf16 %v17_v1, %v15_v0  ;;  %v16_v4 = vld [vmem:[%s1147_s0 + $0x10] sm:$0xff]  ;;  %v19_v5 = vld [vmem:[%s1147_s0 + $0x28] sm:$0xff]  ;;  %v21_v6 = vld [vmem:[%s1147_s0 + $0x38] sm:$0xff]  ;;  %v631_v12 = vpack.c.bf16 %v17_v1, %v15_v0  ;;  %s895_s5 = smov 96   ;;  %s896_s6 = smov 95   ;;  %v963_v21 = vand.u32 127, %v46_v20 }
   0x3   :  { %v712_v7 = vpack.i.bf16 %v16_v4, %v14_v2  ;;  %v18_v8 = vld [vmem:[%s1147_s0 + $0x20] sm:$0xff]  ;;  %v20_v9 = vld [vmem:[%s1147_s0 + $0x30] sm:$0xff]  ;;  %v727_v10 = vpack.i.bf16 %v21_v6, %v19_v5  ;;  %v633_v13 = vpack.c.bf16 %v16_v4, %v14_v2  ;;  %v667_v14 = vpack.c.bf16 %v21_v6, %v19_v5  ;;  %s892_s0 = smov 112   ;;  %s897_s9 = smov 94  }
   0x4   :  { %723 = vrot.lane.b32.xlu1 %v928_v3, %s890_s28  ;;  %v717_v11 = vpack.i.bf16 %v20_v9, %v18_v8  ;;  %v669_v15 = vpack.c.bf16 %v20_v9, %v18_v8  ;;  %632 = vmatprep.subr.bf16.mxu0 %v631_v12  ;;  %v955_v16 = vld [vmem:[%s1148_s1] sm:$0xff]  ;;  %vm48_vm1 = vcmp.lt.s32.totalorder %v963_v21, 127  ;;  %vm81_vm2 = vcmp.lt.s32.totalorder %v963_v21, 126 }
   0x5   :  { %713 = vrot.lane.b32.xlu0 %v712_v7, %s890_s28  ;;  %634 = vmatpush1.bf16.msra.mxu0 %v633_v13  ;;  %v376_v17 = vcombine.high %v955_v16, %v955_v16  ;;  %v369_v19 = vld [vmem:[%s1149_s2] sm:$0xf]  ;;  %vm114_vm3 = vcmp.lt.s32.totalorder %v963_v21, 112  ;;  %vm147_vm4 = vcmp.lt.s32.totalorder %v963_v21, 111  ;;  %vm180_vm5 = vcmp.lt.s32.totalorder %v963_v21, 110 }
   0x6   :  { %668 = vmatprep.subr.bf16.mxu1 %v667_v14  ;;  %vm213_vm6 = vcmp.lt.s32.totalorder %v963_v21, 96  ;;  %vm246_vm7 = vcmp.lt.s32.totalorder %v963_v21, 95  ;;  %vm279_vm8 = vcmp.lt.s32.totalorder %v963_v21, 94 }
   0x7   :  { %670 = vmatpush1.bf16.msra.mxu1 %v669_v15  ;;  %626 = vmatprep.mubr.msk.f32.mxu0 %vm377_vm0, %v376_v17 }
   0x8   :  { %728 = vrot.lane.b32.xlu1 %v727_v10, %s890_s28  ;;  %627 = vmatprep.mubr.msk.f32.mxu1 %vm377_vm0, %v376_v17 }
   0x9   :  { %718 = vrot.lane.b32.xlu0 %v717_v11, %s890_s28 }
   0xc   :  { %738 = vrot.lane.b32.xlu1 %v717_v11, %s891_s29 }
   0xd   :  { %733 = vrot.lane.b32.xlu0 %v712_v7, %s891_s29 }
  0x10   :  { %748 = vrot.lane.b32.xlu1 %v727_v10, %s891_s29 }
  0x11   :  { %743 = vrot.lane.b32.xlu0 %v928_v3, %s891_s29 }
  0x14   :  { %758 = vrot.lane.b32.xlu1 %v717_v11, %s892_s0 }
  0x15   :  { %753 = vrot.lane.b32.xlu0 %v712_v7, %s892_s0 }
  0x18   :  { %768 = vrot.lane.b32.xlu1 %v727_v10, %s892_s0 }
  0x19   :  { %763 = vrot.lane.b32.xlu0 %v928_v3, %s892_s0 }
  0x1c   :  { %778 = vrot.lane.b32.xlu1 %v717_v11, %s893_s30 }
  0x1d   :  { %773 = vrot.lane.b32.xlu0 %v712_v7, %s893_s30 }
  0x20   :  { %788 = vrot.lane.b32.xlu1 %v727_v10, %s893_s30 }
  0x21   :  { %783 = vrot.lane.b32.xlu0 %v928_v3, %s893_s30 }
  0x24   :  { %798 = vrot.lane.b32.xlu1 %v717_v11, %s894_s4 }
  0x25   :  { %793 = vrot.lane.b32.xlu0 %v712_v7, %s894_s4 }
  0x28   :  { %808 = vrot.lane.b32.xlu1 %v727_v10, %s894_s4 }
  0x29   :  { %803 = vrot.lane.b32.xlu0 %v928_v3, %s894_s4 }
  0x2c   :  { %818 = vrot.lane.b32.xlu1 %v717_v11, %s895_s5 }
  0x2d   :  { %813 = vrot.lane.b32.xlu0 %v712_v7, %s895_s5 }
  0x30   :  { %828 = vrot.lane.b32.xlu1 %v727_v10, %s895_s5 }
  0x31   :  { %823 = vrot.lane.b32.xlu0 %v928_v3, %s895_s5 }
  0x34   :  { %838 = vrot.lane.b32.xlu1 %v717_v11, %s896_s6 }
  0x35   :  { %833 = vrot.lane.b32.xlu0 %v712_v7, %s896_s6 }
  0x38   :  { %848 = vrot.lane.b32.xlu1 %v727_v10, %s896_s6 }
  0x39   :  { %843 = vrot.lane.b32.xlu0 %v928_v3, %s896_s6 }
  0x3c   :  { %858 = vrot.lane.b32.xlu1 %v717_v11, %s897_s9 }
  0x3d   :  { %853 = vrot.lane.b32.xlu0 %v712_v7, %s897_s9 }
  0x40   :  { %868 = vrot.lane.b32.xlu1 %v727_v10, %s897_s9 }
  0x41   :  { %863 = vrot.lane.b32.xlu0 %v928_v3, %s897_s9 }
  0x45   :  { %372 = vperm.xlu0 %872, %v369_v19  }
  0x76   :  { %v724_v22 = vpop.permute.xlu1 %723 }
  0x77   :  { %v726_v23 = vunpack.i.h.bf16 %v724_v22  ;;  %v725_v24 = vunpack.i.l.bf16 %v724_v22  ;;  %v714_v25 = vpop.permute.xlu0 %713 }
  0x78   :  { %v716_v26 = vunpack.i.h.bf16 %v714_v25  ;;  %v715_v27 = vunpack.i.l.bf16 %v714_v25 }
  0x7a   :  { %v729_v28 = vpop.permute.xlu1 %728  ;;  %v53_v29 = vsel %vm48_vm1, %v725_v24, %v715_v27  ;;  %v54_v30 = vsel %vm48_vm1, %v726_v23, %v716_v26  ;;  %v49_v31 = vsel %vm48_vm1, %v715_v27, %v725_v24  ;;  %v50_v32 = vsel %vm48_vm1, %v716_v26, %v726_v23 }
  0x7b   :  { %v731_v33 = vunpack.i.h.bf16 %v729_v28  ;;  %v730_v34 = vunpack.i.l.bf16 %v729_v28  ;;  %v719_v35 = vpop.permute.xlu0 %718  ;;  %v635_v36 = vpack.c.bf16 %v54_v30, %v53_v29  ;;  %v637_v37 = vpack.c.bf16 %v50_v32, %v49_v31 }
  0x7c   :  { %v721_v38 = vunpack.i.h.bf16 %v719_v35  ;;  %v720_v39 = vunpack.i.l.bf16 %v719_v35 }
  0x7d   :  { %636 = vmatprep.subr.bf16.mxu0 %v635_v36 }
  0x7e   :  { %638 = vmatpush1.bf16.msra.mxu0 %v637_v37  ;;  %v739_v40 = vpop.permute.xlu1 %738  ;;  %v55_v41 = vsel %vm48_vm1, %v730_v34, %v720_v39  ;;  %v56_v42 = vsel %vm48_vm1, %v731_v33, %v721_v38  ;;  %v51_v43 = vsel %vm48_vm1, %v720_v39, %v730_v34  ;;  %v52_v44 = vsel %vm48_vm1, %v721_v38, %v731_v33 }
  0x7f   :  { %v734_v45 = vpop.permute.xlu0 %733  ;;  %v671_v46 = vpack.c.bf16 %v56_v42, %v55_v41  ;;  %v673_v47 = vpack.c.bf16 %v52_v44, %v51_v43  ;;  %v741_v49 = vunpack.i.h.bf16 %v739_v40  ;;  %v740_v50 = vunpack.i.l.bf16 %v739_v40 }
  0x80   :  { %v736_v54 = vunpack.i.h.bf16 %v734_v45  ;;  %v735_v55 = vunpack.i.l.bf16 %v734_v45 }
  0x81   :  { %672 = vmatprep.subr.bf16.mxu1 %v671_v46 }
  0x82   :  { %674 = vmatpush1.bf16.msra.mxu1 %v673_v47  ;;  %v749_v48 = vpop.permute.xlu1 %748 }
  0x83   :  { %v751_v51 = vunpack.i.h.bf16 %v749_v48  ;;  %v750_v52 = vunpack.i.l.bf16 %v749_v48  ;;  %v744_v53 = vpop.permute.xlu0 %743 }
  0x84   :  { %v746_v56 = vunpack.i.h.bf16 %v744_v53  ;;  %v745_v57 = vunpack.i.l.bf16 %v744_v53 }
  0x85   :  { %v88_v58 = vsel %vm81_vm2, %v750_v52, %v740_v50  ;;  %v89_v59 = vsel %vm81_vm2, %v751_v51, %v741_v49  ;;  %v84_v60 = vsel %vm81_vm2, %v740_v50, %v750_v52  ;;  %v85_v61 = vsel %vm81_vm2, %v741_v49, %v751_v51 }
  0x86   :  { %v759_v62 = vpop.permute.xlu1 %758  ;;  %v86_v63 = vsel %vm81_vm2, %v745_v57, %v735_v55  ;;  %v87_v0 = vsel %vm81_vm2, %v746_v56, %v736_v54  ;;  %v675_v1 = vpack.c.bf16 %v89_v59, %v88_v58  ;;  %v82_v2 = vsel %vm81_vm2, %v735_v55, %v745_v57 }
  0x87   :  { %v754_v3 = vpop.permute.xlu0 %753  ;;  %v639_v4 = vpack.c.bf16 %v87_v0, %v86_v63  ;;  %v83_v5 = vsel %vm81_vm2, %v736_v54, %v746_v56  ;;  %v677_v7 = vpack.c.bf16 %v85_v61, %v84_v60  ;;  %v761_v9 = vunpack.i.h.bf16 %v759_v62 }
  0x88   :  { %676 = vmatprep.subr.bf16.mxu1 %v675_v1  ;;  %v641_v6 = vpack.c.bf16 %v83_v5, %v82_v2  ;;  %v760_v10 = vunpack.i.l.bf16 %v759_v62  ;;  %v756_v14 = vunpack.i.h.bf16 %v754_v3  ;;  %v755_v15 = vunpack.i.l.bf16 %v754_v3 }
  0x89   :  { %640 = vmatprep.subr.bf16.mxu0 %v639_v4  ;;  %678 = vmatpush1.bf16.msra.mxu1 %v677_v7 }
  0x8a   :  { %642 = vmatpush1.bf16.msra.mxu0 %v641_v6  ;;  %v769_v8 = vpop.permute.xlu1 %768 }
  0x8b   :  { %v771_v11 = vunpack.i.h.bf16 %v769_v8  ;;  %v770_v12 = vunpack.i.l.bf16 %v769_v8  ;;  %v764_v13 = vpop.permute.xlu0 %763 }
  0x8c   :  { %v766_v17 = vunpack.i.h.bf16 %v764_v13  ;;  %v765_v18 = vunpack.i.l.bf16 %v764_v13 }
  0x8d   :  { %v121_v19 = vsel %vm114_vm3, %v770_v12, %v760_v10  ;;  %v122_v20 = vsel %vm114_vm3, %v771_v11, %v761_v9  ;;  %v117_v22 = vsel %vm114_vm3, %v760_v10, %v770_v12  ;;  %v118_v23 = vsel %vm114_vm3, %v761_v9, %v771_v11 }
  0x8e   :  { %v779_v24 = vpop.permute.xlu1 %778  ;;  %v119_v25 = vsel %vm114_vm3, %v765_v18, %v755_v15  ;;  %v120_v26 = vsel %vm114_vm3, %v766_v17, %v756_v14  ;;  %v679_v27 = vpack.c.bf16 %v122_v20, %v121_v19  ;;  %v115_v28 = vsel %vm114_vm3, %v755_v15, %v765_v18 }
  0x8f   :  { %v774_v29 = vpop.permute.xlu0 %773  ;;  %v643_v30 = vpack.c.bf16 %v120_v26, %v119_v25  ;;  %v116_v31 = vsel %vm114_vm3, %v756_v14, %v766_v17  ;;  %v681_v33 = vpack.c.bf16 %v118_v23, %v117_v22  ;;  %v781_v35 = vunpack.i.h.bf16 %v779_v24 }
  0x90   :  { %680 = vmatprep.subr.bf16.mxu1 %v679_v27  ;;  %v645_v32 = vpack.c.bf16 %v116_v31, %v115_v28  ;;  %v780_v36 = vunpack.i.l.bf16 %v779_v24  ;;  %v776_v40 = vunpack.i.h.bf16 %v774_v29  ;;  %v775_v41 = vunpack.i.l.bf16 %v774_v29 }
  0x91   :  { %644 = vmatprep.subr.bf16.mxu0 %v643_v30  ;;  %682 = vmatpush1.bf16.msra.mxu1 %v681_v33 }
  0x92   :  { %646 = vmatpush1.bf16.msra.mxu0 %v645_v32  ;;  %v789_v34 = vpop.permute.xlu1 %788 }
  0x93   :  { %v791_v37 = vunpack.i.h.bf16 %v789_v34  ;;  %v790_v38 = vunpack.i.l.bf16 %v789_v34  ;;  %v784_v39 = vpop.permute.xlu0 %783 }
  0x94   :  { %v786_v42 = vunpack.i.h.bf16 %v784_v39  ;;  %v785_v43 = vunpack.i.l.bf16 %v784_v39 }
  0x95   :  { %v154_v44 = vsel %vm147_vm4, %v790_v38, %v780_v36  ;;  %v155_v45 = vsel %vm147_vm4, %v791_v37, %v781_v35  ;;  %v150_v46 = vsel %vm147_vm4, %v780_v36, %v790_v38  ;;  %v151_v47 = vsel %vm147_vm4, %v781_v35, %v791_v37 }
  0x96   :  { %v799_v48 = vpop.permute.xlu1 %798  ;;  %v152_v49 = vsel %vm147_vm4, %v785_v43, %v775_v41  ;;  %v153_v50 = vsel %vm147_vm4, %v786_v42, %v776_v40  ;;  %v683_v51 = vpack.c.bf16 %v155_v45, %v154_v44  ;;  %v148_v52 = vsel %vm147_vm4, %v775_v41, %v785_v43 }
  0x97   :  { %v794_v53 = vpop.permute.xlu0 %793  ;;  %v647_v54 = vpack.c.bf16 %v153_v50, %v152_v49  ;;  %v149_v55 = vsel %vm147_vm4, %v776_v40, %v786_v42  ;;  %v685_v57 = vpack.c.bf16 %v151_v47, %v150_v46  ;;  %v801_v59 = vunpack.i.h.bf16 %v799_v48 }
  0x98   :  { %684 = vmatprep.subr.bf16.mxu1 %v683_v51  ;;  %v649_v56 = vpack.c.bf16 %v149_v55, %v148_v52  ;;  %v800_v60 = vunpack.i.l.bf16 %v799_v48  ;;  %v796_v0 = vunpack.i.h.bf16 %v794_v53  ;;  %v795_v1 = vunpack.i.l.bf16 %v794_v53 }
  0x99   :  { %648 = vmatprep.subr.bf16.mxu0 %v647_v54  ;;  %686 = vmatpush1.bf16.msra.mxu1 %v685_v57 }
  0x9a   :  { %650 = vmatpush1.bf16.msra.mxu0 %v649_v56  ;;  %v809_v58 = vpop.permute.xlu1 %808 }
  0x9b   :  { %v811_v61 = vunpack.i.h.bf16 %v809_v58  ;;  %v810_v62 = vunpack.i.l.bf16 %v809_v58  ;;  %v804_v63 = vpop.permute.xlu0 %803 }
  0x9c   :  { %v806_v2 = vunpack.i.h.bf16 %v804_v63  ;;  %v805_v3 = vunpack.i.l.bf16 %v804_v63 }
  0x9d   :  { %v187_v4 = vsel %vm180_vm5, %v810_v62, %v800_v60  ;;  %v188_v5 = vsel %vm180_vm5, %v811_v61, %v801_v59  ;;  %v183_v6 = vsel %vm180_vm5, %v800_v60, %v810_v62  ;;  %v184_v7 = vsel %vm180_vm5, %v801_v59, %v811_v61 }
  0x9e   :  { %v819_v8 = vpop.permute.xlu1 %818  ;;  %v185_v9 = vsel %vm180_vm5, %v805_v3, %v795_v1  ;;  %v186_v10 = vsel %vm180_vm5, %v806_v2, %v796_v0  ;;  %v687_v11 = vpack.c.bf16 %v188_v5, %v187_v4  ;;  %v181_v12 = vsel %vm180_vm5, %v795_v1, %v805_v3 }
  0x9f   :  { %v814_v13 = vpop.permute.xlu0 %813  ;;  %v651_v14 = vpack.c.bf16 %v186_v10, %v185_v9  ;;  %v182_v15 = vsel %vm180_vm5, %v796_v0, %v806_v2  ;;  %v689_v18 = vpack.c.bf16 %v184_v7, %v183_v6  ;;  %v821_v20 = vunpack.i.h.bf16 %v819_v8 }
  0xa0   :  { %688 = vmatprep.subr.bf16.mxu1 %v687_v11  ;;  %v653_v17 = vpack.c.bf16 %v182_v15, %v181_v12  ;;  %v820_v22 = vunpack.i.l.bf16 %v819_v8  ;;  %v816_v26 = vunpack.i.h.bf16 %v814_v13  ;;  %v815_v27 = vunpack.i.l.bf16 %v814_v13 }
  0xa1   :  { %652 = vmatprep.subr.bf16.mxu0 %v651_v14  ;;  %690 = vmatpush1.bf16.msra.mxu1 %v689_v18 }
  0xa2   :  { %654 = vmatpush1.bf16.msra.mxu0 %v653_v17  ;;  %v829_v19 = vpop.permute.xlu1 %828 }
  0xa3   :  { %v831_v23 = vunpack.i.h.bf16 %v829_v19  ;;  %v830_v24 = vunpack.i.l.bf16 %v829_v19  ;;  %v824_v25 = vpop.permute.xlu0 %823 }
  0xa4   :  { %v826_v28 = vunpack.i.h.bf16 %v824_v25  ;;  %v825_v29 = vunpack.i.l.bf16 %v824_v25 }
  0xa5   :  { %v220_v30 = vsel %vm213_vm6, %v830_v24, %v820_v22  ;;  %v221_v31 = vsel %vm213_vm6, %v831_v23, %v821_v20  ;;  %v216_v32 = vsel %vm213_vm6, %v820_v22, %v830_v24  ;;  %v217_v33 = vsel %vm213_vm6, %v821_v20, %v831_v23 }
  0xa6   :  { %v839_v34 = vpop.permute.xlu1 %838  ;;  %v218_v35 = vsel %vm213_vm6, %v825_v29, %v815_v27  ;;  %v219_v36 = vsel %vm213_vm6, %v826_v28, %v816_v26  ;;  %v691_v37 = vpack.c.bf16 %v221_v31, %v220_v30  ;;  %v214_v38 = vsel %vm213_vm6, %v815_v27, %v825_v29 }
  0xa7   :  { %v834_v39 = vpop.permute.xlu0 %833  ;;  %v655_v40 = vpack.c.bf16 %v219_v36, %v218_v35  ;;  %v215_v41 = vsel %vm213_vm6, %v816_v26, %v826_v28  ;;  %v693_v43 = vpack.c.bf16 %v217_v33, %v216_v32  ;;  %v841_v45 = vunpack.i.h.bf16 %v839_v34 }
  0xa8   :  { %692 = vmatprep.subr.bf16.mxu1 %v691_v37  ;;  %v657_v42 = vpack.c.bf16 %v215_v41, %v214_v38  ;;  %v840_v46 = vunpack.i.l.bf16 %v839_v34  ;;  %v836_v50 = vunpack.i.h.bf16 %v834_v39  ;;  %v835_v51 = vunpack.i.l.bf16 %v834_v39 }
  0xa9   :  { %656 = vmatprep.subr.bf16.mxu0 %v655_v40  ;;  %694 = vmatpush1.bf16.msra.mxu1 %v693_v43 }
  0xaa   :  { %658 = vmatpush1.bf16.msra.mxu0 %v657_v42  ;;  %v849_v44 = vpop.permute.xlu1 %848 }
  0xab   :  { %v851_v47 = vunpack.i.h.bf16 %v849_v44  ;;  %v850_v48 = vunpack.i.l.bf16 %v849_v44  ;;  %v844_v49 = vpop.permute.xlu0 %843 }
  0xac   :  { %v846_v52 = vunpack.i.h.bf16 %v844_v49  ;;  %v845_v53 = vunpack.i.l.bf16 %v844_v49 }
  0xad   :  { %v253_v54 = vsel %vm246_vm7, %v850_v48, %v840_v46  ;;  %v254_v55 = vsel %vm246_vm7, %v851_v47, %v841_v45  ;;  %v249_v56 = vsel %vm246_vm7, %v840_v46, %v850_v48  ;;  %v250_v57 = vsel %vm246_vm7, %v841_v45, %v851_v47 }
  0xae   :  { %v859_v58 = vpop.permute.xlu1 %858  ;;  %v251_v59 = vsel %vm246_vm7, %v845_v53, %v835_v51  ;;  %v252_v60 = vsel %vm246_vm7, %v846_v52, %v836_v50  ;;  %v695_v61 = vpack.c.bf16 %v254_v55, %v253_v54  ;;  %v247_v62 = vsel %vm246_vm7, %v835_v51, %v845_v53 }
  0xaf   :  { %v854_v63 = vpop.permute.xlu0 %853  ;;  %v659_v0 = vpack.c.bf16 %v252_v60, %v251_v59  ;;  %v248_v1 = vsel %vm246_vm7, %v836_v50, %v846_v52  ;;  %v697_v3 = vpack.c.bf16 %v250_v57, %v249_v56  ;;  %v861_v5 = vunpack.i.h.bf16 %v859_v58 }
  0xb0   :  { %696 = vmatprep.subr.bf16.mxu1 %v695_v61  ;;  %v661_v2 = vpack.c.bf16 %v248_v1, %v247_v62  ;;  %v860_v6 = vunpack.i.l.bf16 %v859_v58  ;;  %v856_v10 = vunpack.i.h.bf16 %v854_v63  ;;  %v855_v11 = vunpack.i.l.bf16 %v854_v63 }
  0xb1   :  { %660 = vmatprep.subr.bf16.mxu0 %v659_v0  ;;  %698 = vmatpush1.bf16.msra.mxu1 %v697_v3 }
  0xb2   :  { %662 = vmatpush1.bf16.msra.mxu0 %v661_v2  ;;  %v869_v4 = vpop.permute.xlu1 %868 }
  0xb3   :  { %v871_v7 = vunpack.i.h.bf16 %v869_v4  ;;  %v870_v8 = vunpack.i.l.bf16 %v869_v4  ;;  %v864_v9 = vpop.permute.xlu0 %863 }
  0xb4   :  { %v866_v12 = vunpack.i.h.bf16 %v864_v9  ;;  %v865_v13 = vunpack.i.l.bf16 %v864_v9 }
  0xb5   :  { %v286_v14 = vsel %vm279_vm8, %v870_v8, %v860_v6  ;;  %v287_v15 = vsel %vm279_vm8, %v871_v7, %v861_v5  ;;  %v282_v17 = vsel %vm279_vm8, %v860_v6, %v870_v8  ;;  %v283_v18 = vsel %vm279_vm8, %v861_v5, %v871_v7 }
  0xb6   :  { %v284_v19 = vsel %vm279_vm8, %v865_v13, %v855_v11  ;;  %v285_v20 = vsel %vm279_vm8, %v866_v12, %v856_v10  ;;  %v699_v22 = vpack.c.bf16 %v287_v15, %v286_v14  ;;  %v280_v23 = vsel %vm279_vm8, %v855_v11, %v865_v13 }
  0xb7   :  { %v663_v24 = vpack.c.bf16 %v285_v20, %v284_v19  ;;  %v281_v25 = vsel %vm279_vm8, %v856_v10, %v866_v12  ;;  %v701_v26 = vpack.c.bf16 %v283_v18, %v282_v17 }
  0xb8   :  { %700 = vmatprep.subr.bf16.mxu1 %v699_v22  ;;  %v665_v27 = vpack.c.bf16 %v281_v25, %v280_v23 }
  0xb9   :  { %664 = vmatprep.subr.bf16.mxu0 %v663_v24  ;;  %702 = vmatpush1.bf16.msra.mxu1 %v701_v26 }
  0xba   :  { %666 = vmatpush1.bf16.msra.mxu0 %v665_v27 }
  0xbc   :  { %516 = vmatmul.mubr.f32.vlgmr.msra.gmra.mrb[0].mxu1 %v955_v16 }
  0xbd   :  { %445 = vmatmul.mubr.f32.vlgmr.msra.gmra.mrb[0].mxu0 %v955_v16 }
  0xc4   :  { %v373_v28 = vpop.permute.xlu0 %372 }
 0x18f   :  { %v517_v29 = vpop.f32.mrb[0].mxu1 }
 0x190   :  { %v446_v30 = vpop.f32.mrb[0].mxu0  ;;  %v1103_v31 = vadd.f32 %v517_v29, %v373_v28  ;;  %v519_v32 = vpop.f32.mrb[1].mxu1 }
 0x191   :  { %v1105_v33 = vadd.f32 %v446_v30, %v373_v28  ;;  %v448_v21 = vpop.f32.mrb[1].mxu0  ;;  %v1107_v34 = vadd.f32 %v519_v32, %v373_v28 }
 0x192   :  { %v537_v35 = vsel %vm522_vm9, %v1103_v31, -inf  ;;  %v1111_v36 = vadd.f32 %v448_v21, %v373_v28 }
 0x193   :  { %v523_v16 = vsel %vm522_vm9, %v1105_v33, -inf  ;;  %v538_v37 = vrot.slane %v537_v35, 4  ;;  %v544_v38 = vsel %vm522_vm9, %v1107_v34, -inf }
 0x194   :  { %v524_v39 = vrot.slane %v523_v16, 4  ;;  %v530_v40 = vsel %vm522_vm9, %v1111_v36, -inf  ;;  %v545_v41 = vrot.slane %v544_v38, 4 }
 0x195   :  { %v539_v42 = vmax.f32 %v537_v35, %v538_v37  ;;  %v531_v43 = vrot.slane %v530_v40, 4 }
 0x196   :  { %v525_v44 = vmax.f32 %v523_v16, %v524_v39  ;;  %v546_v45 = vmax.f32 %v544_v38, %v545_v41 }
 0x197   :  { %v540_v46 = vrot.slane %v539_v42, 2  ;;  %v532_v47 = vmax.f32 %v530_v40, %v531_v43 }
 0x198   :  { %v526_v48 = vrot.slane %v525_v44, 2  ;;  %v547_v49 = vrot.slane %v546_v45, 2 }
 0x199   :  { %v541_v50 = vmax.f32 %v539_v42, %v540_v46  ;;  %v533_v51 = vrot.slane %v532_v47, 2 }
 0x19a   :  { %v527_v52 = vmax.f32 %v525_v44, %v526_v48  ;;  %v548_v53 = vmax.f32 %v546_v45, %v547_v49 }
 0x19b   :  { %v542_v54 = vrot.slane %v541_v50, 1  ;;  %v534_v55 = vmax.f32 %v532_v47, %v533_v51 }
 0x19c   :  { %v528_v56 = vrot.slane %v527_v52, 1  ;;  %v549_v57 = vrot.slane %v548_v53, 1 }
 0x19d   :  { %v543_v58 = vmax.f32 %v541_v50, %v542_v54  ;;  %v535_v59 = vrot.slane %v534_v55, 1 }
 0x19e   :  { %v529_v60 = vmax.f32 %v527_v52, %v528_v56  ;;  %v1119_v61 = vmax.f32 %v548_v53, %v549_v57 }
 0x19f   :  { %v553_v62 = vsub.f32 %v1103_v31, %v543_v58  ;;  %v536_v63 = vmax.f32 %v534_v55, %v535_v59 }
 0x1a0   :  { %v551_v0 = vsub.f32 %v1105_v33, %v529_v60  ;;  %v554_v1 = vsub.f32 %v1107_v34, %v1119_v61 }
 0x1a1   :  { %v559_v2 = vmul.f32 1.442695, %v553_v62  ;;  %v552_v3 = vsub.f32 %v1111_v36, %v536_v63 }
 0x1a2   :  { %v555_v4 = vmul.f32 1.442695, %v551_v0  ;;  %v561_v5 = vmul.f32 1.442695, %v554_v1 }
 0x1a3   :  { %874 = vpow2.f32 %v559_v2  ;;  %v557_v6 = vmul.f32 1.442695, %v552_v3 }
 0x1a4   :  { %876 = vpow2.f32 %v555_v4 }
 0x1a5   :  { %878 = vpow2.f32 %v557_v6 }
 0x1a6   :  { %880 = vpow2.f32 %v561_v5 }
 0x1ad   :  { %v875_v7 = vpop.eup %874 }
 0x1ae   :  { %v877_v8 = vpop.eup %876  ;;  %v577_v9 = vsel %vm522_vm9, %v875_v7, 0.0 }
 0x1af   :  { %v879_v10 = vpop.eup %878  ;;  %v563_v11 = vsel %vm522_vm9, %v877_v8, 0.0  ;;  %v578_v12 = vrot.slane %v577_v9, 4 }
 0x1b0   :  { %v881_v13 = vpop.eup %880  ;;  %v564_v14 = vrot.slane %v563_v11, 4  ;;  %v570_v15 = vsel %vm522_vm9, %v879_v10, 0.0 }
 0x1b1   :  { %v579_v17 = vadd.f32 %v578_v12, %v577_v9  ;;  %v571_v18 = vrot.slane %v570_v15, 4  ;;  %v584_v19 = vsel %vm522_vm9, %v881_v13, 0.0 }
 0x1b2   :  { %v565_v20 = vadd.f32 %v564_v14, %v563_v11  ;;  %v585_v22 = vrot.slane %v584_v19, 4 }
 0x1b3   :  { %v580_v23 = vrot.slane %v579_v17, 2  ;;  %v572_v24 = vadd.f32 %v571_v18, %v570_v15 }
 0x1b4   :  { %v566_v25 = vrot.slane %v565_v20, 2  ;;  %v586_v26 = vadd.f32 %v585_v22, %v584_v19 }
 0x1b5   :  { %v581_v27 = vadd.f32 %v580_v23, %v579_v17  ;;  %v573_v28 = vrot.slane %v572_v24, 2 }
 0x1b6   :  { %v567_v29 = vadd.f32 %v566_v25, %v565_v20  ;;  %v587_v30 = vrot.slane %v586_v26, 2 }
 0x1b7   :  { %v582_v32 = vrot.slane %v581_v27, 1  ;;  %v574_v21 = vadd.f32 %v573_v28, %v572_v24 }
 0x1b8   :  { %v568_v35 = vrot.slane %v567_v29, 1  ;;  %v588_v16 = vadd.f32 %v587_v30, %v586_v26 }
 0x1b9   :  { %v583_v37 = vadd.f32 %v582_v32, %v581_v27  ;;  %v575_v38 = vrot.slane %v574_v21, 1 }
 0x1ba   :  { %v569_v39 = vadd.f32 %v568_v35, %v567_v29  ;;  %v589_v40 = vrot.slane %v588_v16, 1 }
 0x1bb   :  { %882 = vlog2.f32 %v583_v37  ;;  %v576_v41 = vadd.f32 %v575_v38, %v574_v21 }
 0x1bc   :  { %884 = vlog2.f32 %v569_v39  ;;  %v590_v42 = vadd.f32 %v589_v40, %v588_v16 }
 0x1bd   :  { %886 = vlog2.f32 %v576_v41 }
 0x1be   :  { %888 = vlog2.f32 %v590_v42 }
 0x1c5   :  { %v883_v43 = vpop.eup %882 }
 0x1c6   :  { %v885_v44 = vpop.eup %884  ;;  %v596_v45 = vmul.f32 0.6931472, %v883_v43 }
 0x1c7   :  { %v887_v46 = vpop.eup %886  ;;  %v592_v47 = vmul.f32 0.6931472, %v885_v44 }
 0x1c8   :  { %v889_v48 = vpop.eup %888  ;;  %v601_v49 = vadd.f32 %v596_v45, %v543_v58  ;;  %v594_v50 = vmul.f32 0.6931472, %v887_v46 }
 0x1c9   :  { %v599_v51 = vadd.f32 %v592_v47, %v529_v60  ;;  %v598_v52 = vmul.f32 0.6931472, %v889_v48 }
 0x1ca   :  { %v600_v53 = vadd.f32 %v594_v50, %v536_v63  ;;  %v605_v55 = vsub.f32 %v1103_v31, %v601_v49 }
 0x1cb   :  { %v603_v54 = vsub.f32 %v1105_v33, %v599_v51  ;;  %v602_v56 = vadd.f32 %v598_v52, %v1119_v61 }
 0x1cc   :  { %v604_v57 = vsub.f32 %v1111_v36, %v600_v53 }
 0x1cd   :  { %v606_v59 = vsub.f32 %v1107_v34, %v602_v56 }
 0x1ce   :  { %v609_v62 = vcombine.low %v603_v54, %v604_v57 }
 0x1cf   :  { %v616_v0 = vcombine.low %v605_v55, %v606_v59 }
 0x1d0   :  { %611 = vst [vmem:[%s1150_s3] sm:$0xff] %v609_v62  ;;  %628 = vst [vmem:[%s1150_s3 + $0x10] sm:$0xff] %v609_v62 }
 0x1d1   :  { %629 = vst [vmem:[%s1150_s3 + $0x8] sm:$0xff] %v616_v0  ;;  %630 = vst [vmem:[%s1150_s3 + $0x18] sm:$0xff] %v616_v0 }

</bundles_post_ra>
